<compile_context>
chip_gen: v7x
topology: tpu7x:2x2x1
jax: 0.10.0
libtpu: 0.0.40
codegen_flags: <defaults>
</compile_context>

<pallas_src>
import functools

import jax
import jax.numpy as jnp
from jax.experimental import pallas as pl
from jax.experimental.pallas import tpu as pltpu


def _round_up(x, m):
    return -(-x // m) * m


def _vmem_capacity_bytes():
    """Trace-time VMEM capacity; conservative (v7x-sized) fallback if unavailable."""
    try:
        return int(pltpu.get_tpu_info().vmem_capacity_bytes)
    except Exception:  # pragma: no cover - emulator / older jax
        return 64 << 20


def _weighted_sum_kernel(attn_ref, *refs, height):
    """attn_ref: [bR, height] f32.  refs: `height` inputs [bR, T] + output [bR, T]."""
    x_refs = refs[:height]
    o_ref = refs[height]
    a = attn_ref[...]                                       # [bR, height] f32
    # Unrolled accumulation over the small static height axis: per-slice cast,
    # one f32 accumulator, attn used as a lane-slice + lane broadcast (cheap).
    acc = x_refs[0][...].astype(jnp.float32) * a[:, 0:1]
    for h in range(1, height):
        acc = acc + x_refs[h][...].astype(jnp.float32) * a[:, h : h + 1]
    o_ref[...] = acc.astype(o_ref.dtype)


def _attention_weights(in_feats, w1, w2):
    """Tiny phase-1: pooled stats + MLP + softmax.  Returns [B*C, height] f32."""
    height = len(in_feats)
    B, C, _, _ = in_feats[0].shape
    # adaptive_avg_pool2d(sum_h x_h) == sum_h mean_spatial(x_h); f32 accumulation
    # fused into each reduction (no materialized f32 copy of the activations).
    pooled = sum(jnp.mean(f, axis=(2, 3), dtype=jnp.float32) for f in in_feats)  # [B, C]
    h1 = pooled @ w1.astype(jnp.float32).T                                        # [B, d]
    h1 = jax.nn.gelu(h1, approximate=False)                                       # exact GELU (nn.GELU default)
    logits = h1 @ w2.astype(jnp.float32).T                                        # [B, height*C]
    attn = jax.nn.softmax(logits.reshape(B, height, C), axis=1)                   # [B, height, C]
    # Transpose so height is the (tiny) lane axis of the per-row attention block.
    return jnp.transpose(attn, (0, 2, 1)).reshape(B * C, height)                  # [B*C, height]


def _pick_blocks(rows, hw, height, itemsize, vmem_cap):
    """Choose (row_block, hw_tile, hw_padded) for the streaming phase."""
    # Total double-buffered working set: comfortably inside every generation
    # (v5e/v6e 128 MiB, v7x 64 MiB per TensorCore).
    footprint_budget = min(vmem_cap // 2, 32 << 20)
    # ~4 MiB of streamed operand bytes per grid step.
    step_target_bytes = 4 << 20

    stream_per_elem = (height + 1) * itemsize                 # height inputs + output
    footprint_per_elem = 2 * (height + 1) * itemsize + 12     # double-buffered + f32 acc/cast temps

    step_elems = min(step_target_bytes // stream_per_elem,
                     footprint_budget // footprint_per_elem)
    step_elems = max(step_elems, 8 * 128)

    hw128 = _round_up(hw, 128)

    # Everything fits in one step: single block (optionally split the row axis
    # once so both TensorCores of a v7x chip get work when there is enough).
    if rows * hw128 <= step_elems:
        bR = rows
        if rows % 16 == 0 and rows * hw128 * stream_per_elem > (1 << 20):
            bR = rows // 2
        return int(bR), int(hw128), int(hw128)

    # Prefer keeping all rows in a block; otherwise pick a sublane-dense row block.
    if rows * 128 <= step_elems:
        bR = rows
    else:
        bR = min(rows, max(8, (step_elems // 512) // 8 * 8))  # keep >=512 lanes/step

    tile_max = max(128, (step_elems // bR) // 128 * 128)
    n_hw = -(-hw128 // tile_max)
    tile = _round_up(-(-hw128 // n_hw), 128)                  # balanced tile, <= tile_max
    hw_padded = n_hw * tile                                   # pad overhead <= 128 lanes/block
    return int(bR), int(tile), int(hw_padded)


def cffb_pallas(in_feats, w1, w2):
    """in_feats: list of `height` arrays, each [B, C, H, W] (NCHW).
    w1: [d, C]          (Conv2d(dim, d, 1, bias=False) weight, squeezed)
    w2: [height*C, d]   (Conv2d(d, dim*height, 1, bias=False) weight, squeezed)
    Returns [B, C, H, W].

    Note: for sub-f32 inputs (e.g. bf16) the output is cast back to the input
    dtype after f32 accumulation, matching the usual mixed-precision contract."""
    height = len(in_feats)
    B, C, H, W = in_feats[0].shape
    HW = H * W
    rows = B * C
    dtype = in_feats[0].dtype
    itemsize = jnp.dtype(dtype).itemsize

    attn_rows = _attention_weights(in_feats, w1, w2)          # [rows, height] f32 (tiny)

    vmem_cap = _vmem_capacity_bytes()
    bR, tile, hw_padded = _pick_blocks(rows, HW, height, itemsize, vmem_cap)

    xs = [f.reshape(rows, HW) for f in in_feats]              # contiguous reshape: no copy
    if hw_padded != HW:
        # Pad so every block (and every store) is lane-dense and bounded; costs
        # one extra HBM copy of each input only when H*W is not 128-aligned.
        xs = [jnp.pad(x, ((0, 0), (0, hw_padded - HW))) for x in xs]

    grid = (pl.cdiv(rows, bR), hw_padded // tile)

    attn_spec = pl.BlockSpec((bR, height), lambda r, t: (r, 0))
    x_spec = pl.BlockSpec((bR, tile), lambda r, t: (r, t))
    out_spec = pl.BlockSpec((bR, tile), lambda r, t: (r, t))

    # Explicit VMEM budget (double-buffered streams + padded attn block + f32 temps),
    # with headroom but capped below physical VMEM of the current generation.
    needed = (2 * (height + 1) * bR * tile * itemsize
              + 2 * bR * 128 * 4
              + 2 * bR * tile * 4)
    vmem_limit = int(min(max(needed * 3 // 2, 32 << 20), vmem_cap - (8 << 20)))
    vmem_limit = max(vmem_limit, needed + (2 << 20))

    kernel = functools.partial(_weighted_sum_kernel, height=height)

    # Both axes are independent -> "parallel" for megacore sharding.  Explicit
    # pltpu.CORE_PARALLEL / core_map splitting of the HW-tile axis for v7x is
    # intentionally left out for portability across generations.
    out = pl.pallas_call(
        kernel,
        out_shape=jax.ShapeDtypeStruct((rows, hw_padded), dtype),
        grid_spec=pltpu.PrefetchScalarGridSpec(
            num_scalar_prefetch=0,
            grid=grid,
            in_specs=[attn_spec] + [x_spec] * height,
            out_specs=out_spec,
        ),
        compiler_params=pltpu.CompilerParams(
            dimension_semantics=("parallel", "parallel"),
            vmem_limit_bytes=vmem_limit,
        ),
    )(attn_rows, *xs)

    if hw_padded != HW:
        out = out[:, :HW]
    return out.reshape(B, C, H, W)


def cffb_reference(in_feats, w1, w2):
    """Pure-JAX reference replicating the PyTorch forward exactly."""
    x = jnp.stack(in_feats, axis=1)                       # [B, height, C, H, W]
    B, height, C, H, W = x.shape
    feats_sum = jnp.sum(x, axis=1)                        # [B, C, H, W]
    pooled = jnp.mean(feats_sum, axis=(2, 3))             # [B, C]
    h1 = pooled @ w1.T                                    # [B, d]
    h1 = jax.nn.gelu(h1, approximate=False)
    logits = h1 @ w2.T                                    # [B, height*C]
    attn = jax.nn.softmax(logits.reshape(B, height, C), axis=1)
    out = jnp.sum(x * attn[:, :, :, None, None], axis=1)  # [B, C, H, W]
    return out


if __name__ == "__main__":
    B, dim, H, W = 2, 8, 16, 16
    height, reduction = 2, 8
    d = max(dim // reduction, 4)

    key = jax.random.PRNGKey(0)
    k0, k1, kw1, kw2 = jax.random.split(key, 4)
    feat0 = jax.random.normal(k0, (B, dim, H, W), dtype=jnp.float32)
    feat1 = jax.random.normal(k1, (B, dim, H, W), dtype=jnp.float32)
    # Conv2d 1x1 no-bias weights, deterministically initialized.
    w1 = jax.random.normal(kw1, (d, dim), dtype=jnp.float32) * 0.1
    w2 = jax.random.normal(kw2, (dim * height, d), dtype=jnp.float32) * 0.1

    out = cffb_pallas([feat0, feat1], w1, w2)
    out = jax.block_until_ready(out)

    ref = cffb_reference([feat0, feat1], w1, w2)
    assert out.shape == (B, dim, H, W)
    assert jnp.allclose(out, ref, atol=2e-5, rtol=2e-5), "mismatch vs reference"
    print("KERNEL_OK")
</pallas_src>

<mosaic_0001>
module attributes {stable_mosaic.version = 11 : i64} {
  func.func @_weighted_sum_kernel(%arg0: i32, %arg1: i32, %arg2: memref<16x2xf32, #tpu.memory_space<vmem>>, %arg3: memref<16x256xf32, #tpu.memory_space<vmem>>, %arg4: memref<16x256xf32, #tpu.memory_space<vmem>>, %arg5: memref<16x256xf32, #tpu.memory_space<vmem>>) attributes {dimension_semantics = [#tpu.dimension_semantics<parallel>, #tpu.dimension_semantics<parallel>], iteration_bounds = array<i64: 1, 1>, scalar_prefetch = 0 : i64, scratch_operands = 0 : i64, tpu.core_type = #tpu.core_type<tc>, window_params = [{transform_indices = @transform_0, window_bounds = array<i64: 16, 2>}, {transform_indices = @transform_1, window_bounds = array<i64: 16, 256>}, {transform_indices = @transform_2, window_bounds = array<i64: 16, 256>}, {transform_indices = @transform_3, window_bounds = array<i64: 16, 256>}]} {
    %c0 = arith.constant 0 : index
    %c0_0 = arith.constant 0 : index
    %0 = vector.load %arg2[%c0, %c0_0] : memref<16x2xf32, #tpu.memory_space<vmem>>, vector<16x2xf32>
    %c0_1 = arith.constant 0 : index
    %c0_2 = arith.constant 0 : index
    %1 = vector.load %arg3[%c0_1, %c0_2] : memref<16x256xf32, #tpu.memory_space<vmem>>, vector<16x256xf32>
    %2 = vector.extract_strided_slice %0 {offsets = [0, 0], sizes = [16, 1], strides = [1, 1]} : vector<16x2xf32> to vector<16x1xf32>
    %3 = vector.broadcast %2 : vector<16x1xf32> to vector<16x256xf32>
    %4 = arith.mulf %1, %3 : vector<16x256xf32>
    %c0_3 = arith.constant 0 : index
    %c0_4 = arith.constant 0 : index
    %5 = vector.load %arg4[%c0_3, %c0_4] : memref<16x256xf32, #tpu.memory_space<vmem>>, vector<16x256xf32>
    %6 = vector.extract_strided_slice %0 {offsets = [0, 1], sizes = [16, 1], strides = [1, 1]} : vector<16x2xf32> to vector<16x1xf32>
    %7 = vector.broadcast %6 : vector<16x1xf32> to vector<16x256xf32>
    %8 = arith.mulf %5, %7 : vector<16x256xf32>
    %9 = arith.addf %4, %8 : vector<16x256xf32>
    %c0_5 = arith.constant 0 : index
    %c0_6 = arith.constant 0 : index
    %10 = vector.load %arg5[%c0_5, %c0_6] : memref<16x256xf32, #tpu.memory_space<vmem>>, vector<16x256xf32>
    tpu.vector_store %arg5[%c0_5, %c0_6], %9 {strides = array<i32>} : memref<16x256xf32, #tpu.memory_space<vmem>>, vector<16x256xf32>,
    return
  }
  func.func @transform_0(%arg0: i32, %arg1: i32) -> (i32, i32) {
    %c0_i32 = arith.constant 0 : i32
    %c0_i32_0 = arith.constant 0 : i32
    return %arg0, %c0_i32 : i32, i32
  }
  func.func @transform_1(%arg0: i32, %arg1: i32) -> (i32, i32) {
    %c0_i32 = arith.constant 0 : i32
    return %arg0, %arg1 : i32, i32
  }
  func.func @transform_2(%arg0: i32, %arg1: i32) -> (i32, i32) {
    %c0_i32 = arith.constant 0 : i32
    return %arg0, %arg1 : i32, i32
  }
  func.func @transform_3(%arg0: i32, %arg1: i32) -> (i32, i32) {
    %c0_i32 = arith.constant 0 : i32
    return %arg0, %arg1 : i32, i32
  }
}

</mosaic_0001>

<bundles_post_ra>
// kernel: tpu_custom_call.1
= control target key start
LH: loop header
LB: loop body
LE: loop exit
PB: predicated region body
PF: predicated region fallthrough
CT: control target
= control target key end

     0   :  { %8 = vsyncpa [#allocation3], 0  ;;  %s265_s0 = inlined_call_operand.vmem [shape: f32[16,2], index: 0, kind: input, shape index: {}]   ;;  %s266_s1 = inlined_call_operand.hbm [shape: f32[16,256], index: 1, kind: input, shape index: {}]   ;;  %s267_s2 = inlined_call_operand.hbm [shape: f32[16,256], index: 2, kind: input, shape index: {}]   ;;  %s268_s3 = inlined_call_operand.hbm [shape: f32[16,256], index: 3, kind: output, shape index: {}]  }
   0x1   :  { %9 = vsyncpa [#allocation6], 0 }
   0x2   :  { %10 = vsyncpa [#allocation4], 0  ;;  %s187_s12 = smov [#allocation2]   ;;  %s115_s16 = scalar_lea.hbm %s266_s1, 512 }
   0x3   :  { %s18_s13 = sshll.u32 %s187_s12, 4  ;;  %p116_p0 = scmp.ne.s32.totalorder %s266_s1, %s115_s16  ;;  %s19_s13 = int_to_ptr.vmem [resolvable:$true] %s18_s13 }
   0x4   :  { %p119_p1 = scmp.lt.u32.totalorder %s115_s16, %s266_s1 }
   0x6   :  { %p121_p2 = pnand %p119_p1, %p116_p0 }
   0x8   :  { %124 = shalt.err (!%p121_p2)
}
   0x9   :  { %s125_s21 = scalar_lea.vmem %s19_s13, 512  ;;  %p130_p4 = scmp.lt.s32.totalorder %s19_s13, %s19_s13 }
   0xa   :  { %p126_p3 = scmp.ne.s32.totalorder %s19_s13, %s125_s21  ;;  %p131_p5 = scmp.lt.s32.totalorder %s125_s21, %s125_s21 }
   0xc   :  { %p132_p6 = por %p131_p5, %p130_p4 }
   0xe   :  { %p133_p7 = pnand %p132_p6, %p126_p3 }
  0x10   :  { %136 = shalt.err (!%p133_p7)
}
  0x11   :  { %s188_s22 = smov 256   ;;  %s189_s23 = smov 16  }
  0x12   :  { %24 = dma.hbm_to_vmem [thread:$0]  %s266_s1, 512, %s19_s13, [#allocation3], %s188_s22, %s188_s22, %s189_s23  }
  0x13   :  { %s190_s26 = smov [#allocation5]   ;;  %s137_s30 = scalar_lea.hbm %s267_s2, 512 }
  0x14   :  { %s30_s27 = sshll.u32 %s190_s26, 4  ;;  %p138_p8 = scmp.ne.s32.totalorder %s267_s2, %s137_s30  ;;  %s31_s27 = int_to_ptr.vmem [resolvable:$true] %s30_s27 }
  0x15   :  { %p141_p9 = scmp.lt.u32.totalorder %s137_s30, %s267_s2 }
  0x17   :  { %p143_p10 = pnand %p141_p9, %p138_p8 }
  0x19   :  { %146 = shalt.err (!%p143_p10)
}
  0x1a   :  { %s147_s8 = scalar_lea.vmem %s31_s27, 512  ;;  %p152_p12 = scmp.lt.s32.totalorder %s31_s27, %s31_s27 }
  0x1b   :  { %p148_p11 = scmp.ne.s32.totalorder %s31_s27, %s147_s8  ;;  %p153_p13 = scmp.lt.s32.totalorder %s147_s8, %s147_s8 }
  0x1d   :  { %p154_p0 = por %p153_p13, %p152_p12 }
  0x1f   :  { %p155_p1 = pnand %p154_p0, %p148_p11 }
  0x21   :  { %158 = shalt.err (!%p155_p1)
}
  0x22   :  { %36 = dma.hbm_to_vmem [thread:$0]  %s267_s2, 512, %s31_s27, [#allocation6], %s188_s22, %s188_s22, %s189_s23  }
  0x23   :  { %181 = dma.done.wait [#allocation3], 512  }
  0x24   :  { %182 = vsyncadd [#allocation3], 4294966784 }
  0x25   :  { %183 = dma.done.wait [#allocation6], 512  }
  0x26   :  { %184 = vsyncadd [#allocation6], 4294966784  ;;  %v191_v0 = vmov 1   ;;  %v192_v1 = vmov 0   ;;  %v43_v2 = vld [vmem:[%s265_s0] sm:$0xff]  ;;  %v44_v3 = vld [vmem:[%s265_s0 + $0x8] sm:$0xff] }
  0x27   :  { %113 = vset.pattern.permute.xlu1 %v191_v0  ;;  %112 = vset.pattern.permute.xlu0 %v192_v1  ;;  %v63_v4 = vld [vmem:[#allocation5] sm:$0xff]  ;;  %v64_v5 = vld [vmem:[#allocation5 + $0x8] sm:$0xff]  ;;  %v65_v14 = vld [vmem:[#allocation5 + $0x10] sm:$0xff]  ;;  %s193_s0 = smov [#allocation7]  }
  0x28   :  { %68 = vperm.xlu1 %113, %v43_v2   ;;  %51 = vperm.xlu0 %112, %v43_v2   ;;  %v45_v6 = vld [vmem:[#allocation2] sm:$0xff]  ;;  %v46_v7 = vld [vmem:[#allocation2 + $0x8] sm:$0xff]  ;;  %v66_v15 = vld [vmem:[#allocation5 + $0x18] sm:$0xff]  ;;  %s92_s2 = sshll.u32 %s193_s0, 4  ;;  %s93_s2 = int_to_ptr.vmem [resolvable:$true] %s92_s2 }
  0x29   :  { %v47_v16 = vld [vmem:[#allocation2 + $0x10] sm:$0xff]  ;;  %v48_v17 = vld [vmem:[#allocation2 + $0x18] sm:$0xff]  ;;  %s159_s14 = scalar_lea.vmem %s93_s2, 512  ;;  %p164_p3 = scmp.lt.s32.totalorder %s93_s2, %s93_s2 }
  0x2a   :  { %p160_p2 = scmp.ne.s32.totalorder %s93_s2, %s159_s14  ;;  %p165_p4 = scmp.lt.s32.totalorder %s159_s14, %s159_s14 }
  0x2c   :  { %72 = vperm.xlu1 %113, %v44_v3   ;;  %56 = vperm.xlu0 %112, %v44_v3   ;;  %p166_p5 = por %p165_p4, %p164_p3 }
  0x2e   :  { %p167_p6 = pnand %p166_p5, %p160_p2 }
  0x30   :  { %114 = vset.pattern.permute.xlu0 %v191_v0 }
  0xa7   :  { %v69_v8 = vpop.permute.xlu1 %68  ;;  %v52_v9 = vpop.permute.xlu0 %51 }
  0xa8   :  { %v75_v10 = vmul.f32 %v69_v8, %v63_v4  ;;  %v76_v11 = vmul.f32 %v69_v8, %v64_v5  ;;  %v59_v12 = vmul.f32 %v52_v9, %v45_v6  ;;  %v60_v13 = vmul.f32 %v52_v9, %v46_v7 }
  0xaa   :  { %v79_v18 = vadd.f32 %v75_v10, %v59_v12  ;;  %v80_v19 = vadd.f32 %v76_v11, %v60_v13 }
  0xab   :  { %v73_v20 = vpop.permute.xlu1 %72  ;;  %v57_v21 = vpop.permute.xlu0 %56 }
  0xac   :  { %83 = vst [vmem:[#allocation7] sm:$0xff] %v79_v18  ;;  %84 = vst [vmem:[#allocation7 + $0x8] sm:$0xff] %v80_v19  ;;  %v77_v22 = vmul.f32 %v73_v20, %v65_v14  ;;  %v78_v23 = vmul.f32 %v73_v20, %v66_v15  ;;  %v61_v24 = vmul.f32 %v57_v21, %v47_v16 }
  0xad   :  { %v62_v25 = vmul.f32 %v57_v21, %v48_v17 }
  0xae   :  { %v81_v26 = vadd.f32 %v77_v22, %v61_v24 }
  0xaf   :  { %v82_v27 = vadd.f32 %v78_v23, %v62_v25 }
  0xb0   :  { %85 = vst [vmem:[#allocation7 + $0x10] sm:$0xff] %v81_v26 }
  0xb1   :  { %86 = vst [vmem:[#allocation7 + $0x18] sm:$0xff] %v82_v27 }
  0xb2   :  { %170 = shalt.err (!%p167_p6)
}
  0xb3   :  { %s171_s17 = scalar_lea.hbm %s268_s3, 512 }
  0xb4   :  { %p172_p7 = scmp.ne.s32.totalorder %s268_s3, %s171_s17  ;;  %p175_p8 = scmp.lt.u32.totalorder %s171_s17, %s268_s3 }
  0xb6   :  { %p177_p9 = pnand %p175_p8, %p172_p7 }
  0xb8   :  { %180 = shalt.err (!%p177_p9)
}
  0xb9   :  { %98 = dma.vmem_to_hbm [thread:$0]  %s93_s2, 512, %s268_s3, [#allocation4], %s188_s22, %s188_s22, %s189_s23  }
  0xba   :  { %185 = dma.done.wait [#allocation4], 512  }
  0xbb   :  { %186 = vsyncadd [#allocation4], 4294966784 }
  0xbc   :  { %102 = vsyncpa [#allocation3], 1 }
  0xbd   :  { %103 = vsyncpa [#allocation6], 1 }
  0xbe   :  { %104 = vsyncpa [#allocation4], 1 }

</bundles_post_ra>
